<compile_context>
chip_gen: v7x
topology: tpu7x:2x2x1
jax: 0.10.0
libtpu: 0.0.40
codegen_flags: <defaults>
</compile_context>

<pallas_src>
import jax
import jax.numpy as jnp
from jax.experimental import pallas as pl
from jax.experimental.pallas import tpu as pltpu


def reflex_kernel(scal_ref, x_ref, w_ref, o_ref):
    """VPU-only forward.

    scal_ref : SMEM (5,)  f32  = [b1[0], b1[1], W2[0,0], W2[0,1], b2[0]]
    x_ref    : VMEM (B,D) f32  input state (batch-major, PyTorch Linear layout)
    w_ref    : VMEM (2,D) f32  reflex_detector.weight in PyTorch (out,in) layout
    o_ref    : VMEM (B,1) f32  reflex output
    """
    x = x_ref[...]                                   # (B, D)
    w = w_ref[...]                                   # (2, D)

    # reflex_detector: Linear(D, 2) + ReLU, done as two lane reductions
    # (elementwise multiply on the VPU, reduce over lanes on the XLU).
    z0 = jnp.sum(x * w[0:1, :], axis=-1, keepdims=True) + scal_ref[0]  # (B, 1)
    z1 = jnp.sum(x * w[1:2, :], axis=-1, keepdims=True) + scal_ref[1]  # (B, 1)
    a0 = jnp.maximum(z0, 0.0)
    a1 = jnp.maximum(z1, 0.0)

    # reflex: Linear(2, 1) as pure VPU scalar multiply-adds (no (B,2)x(2,1) MXU op).
    o_ref[...] = a0 * scal_ref[2] + a1 * scal_ref[3] + scal_ref[4]     # (B, 1)


def hand_crafted_reflex(state, w1, scalars):
    """state: (B, D) f32. w1: (2, D) f32 (PyTorch weight layout). scalars: (5,) f32."""
    B = state.shape[0]
    return pl.pallas_call(
        reflex_kernel,
        out_shape=jax.ShapeDtypeStruct((B, 1), jnp.float32),
        in_specs=[
            pl.BlockSpec(memory_space=pltpu.MemorySpace.SMEM),   # packed scalars
            pl.BlockSpec(memory_space=pltpu.MemorySpace.VMEM),   # state
            pl.BlockSpec(memory_space=pltpu.MemorySpace.VMEM),   # detector weights
        ],
        out_specs=pl.BlockSpec(memory_space=pltpu.MemorySpace.VMEM),
    )(scalars, state, w1)


def make_params(input_dim, threshold=0.15, reflex_force_scale=1.0):
    """Deterministic parameters mirroring HandCraftedReflex.__init__.

    Returns:
      w1      : (2, input_dim) f32  reflex_detector.weight (zeros; [0,1]=1, [1,1]=-1)
      scalars : (5,) f32            [b1[0], b1[1], W2[0,0], W2[0,1], b2[0]]
    """
    # (assumes input_dim >= 2, exactly like the PyTorch module's hardcoded column 1)
    w1 = jnp.zeros((2, input_dim), dtype=jnp.float32)
    w1 = w1.at[0, 1].set(1.0)
    w1 = w1.at[1, 1].set(-1.0)
    s = reflex_force_scale / (0.2 - threshold)
    scalars = jnp.array([-threshold, -threshold, s, -s, 0.0], dtype=jnp.float32)
    return w1, scalars


if __name__ == "__main__":
    # observation_space ~ two spaces of shape (3,) and (5,)  =>  input_dim = 8
    input_dim = 8
    batch = 8
    threshold = 0.15
    reflex_force_scale = 1.0

    key = jax.random.PRNGKey(0)
    state = jax.random.normal(key, (batch, input_dim), dtype=jnp.float32)

    w1, scalars = make_params(input_dim, threshold, reflex_force_scale)

    out = hand_crafted_reflex(state, w1, scalars)
    out = jax.block_until_ready(out)

    # Pure-JAX reference of the same semantics (general Linear-ReLU-Linear form).
    a1_ref = jnp.maximum(state @ w1.T + scalars[0:2][None, :], 0.0)
    ref = a1_ref[:, 0:1] * scalars[2] + a1_ref[:, 1:2] * scalars[3] + scalars[4]

    assert out.shape == (batch, 1)
    assert jnp.allclose(out, ref, atol=1e-5, rtol=1e-5)

    print("KERNEL_OK")
</pallas_src>

<mosaic_0001>
module attributes {stable_mosaic.version = 11 : i64} {
  func.func @reflex_kernel(%arg0: memref<5xf32, #tpu.memory_space<smem>>, %arg1: memref<8x8xf32, #tpu.memory_space<vmem>>, %arg2: memref<2x8xf32, #tpu.memory_space<vmem>>, %arg3: memref<8x1xf32, #tpu.memory_space<vmem>>) attributes {dimension_semantics = [], scalar_prefetch = 0 : i64, scratch_operands = 0 : i64, tpu.core_type = #tpu.core_type<tc>} {
    %c0 = arith.constant 0 : index
    %c0_0 = arith.constant 0 : index
    %0 = vector.load %arg1[%c0, %c0_0] : memref<8x8xf32, #tpu.memory_space<vmem>>, vector<8x8xf32>
    %c0_1 = arith.constant 0 : index
    %c0_2 = arith.constant 0 : index
    %1 = vector.load %arg2[%c0_1, %c0_2] : memref<2x8xf32, #tpu.memory_space<vmem>>, vector<2x8xf32>
    %2 = vector.extract_strided_slice %1 {offsets = [0, 0], sizes = [1, 8], strides = [1, 1]} : vector<2x8xf32> to vector<1x8xf32>
    %3 = vector.broadcast %2 : vector<1x8xf32> to vector<8x8xf32>
    %4 = arith.mulf %0, %3 : vector<8x8xf32>
    %cst = arith.constant dense<0.000000e+00> : vector<8xf32>
    %5 = vector.multi_reduction <add>, %4, %cst [1] : vector<8x8xf32> to vector<8xf32>
    %6 = vector.shape_cast %5 : vector<8xf32> to vector<8x1xf32>
    %c0_3 = arith.constant 0 : index
    %7 = memref.load %arg0[%c0_3] : memref<5xf32, #tpu.memory_space<smem>>
    %8 = vector.broadcast %7 : f32 to vector<8x1xf32>
    %9 = arith.addf %6, %8 : vector<8x1xf32>
    %10 = vector.extract_strided_slice %1 {offsets = [1, 0], sizes = [1, 8], strides = [1, 1]} : vector<2x8xf32> to vector<1x8xf32>
    %11 = vector.broadcast %10 : vector<1x8xf32> to vector<8x8xf32>
    %12 = arith.mulf %0, %11 : vector<8x8xf32>
    %cst_4 = arith.constant dense<0.000000e+00> : vector<8xf32>
    %13 = vector.multi_reduction <add>, %12, %cst_4 [1] : vector<8x8xf32> to vector<8xf32>
    %14 = vector.shape_cast %13 : vector<8xf32> to vector<8x1xf32>
    %c1 = arith.constant 1 : index
    %15 = memref.load %arg0[%c1] : memref<5xf32, #tpu.memory_space<smem>>
    %16 = vector.broadcast %15 : f32 to vector<8x1xf32>
    %17 = arith.addf %14, %16 : vector<8x1xf32>
    %cst_5 = arith.constant 0.000000e+00 : f32
    %18 = vector.broadcast %cst_5 : f32 to vector<8x1xf32>
    %19 = arith.maximumf %9, %18 : vector<8x1xf32>
    %cst_6 = arith.constant 0.000000e+00 : f32
    %20 = vector.broadcast %cst_6 : f32 to vector<8x1xf32>
    %21 = arith.maximumf %17, %20 : vector<8x1xf32>
    %c2 = arith.constant 2 : index
    %22 = memref.load %arg0[%c2] : memref<5xf32, #tpu.memory_space<smem>>
    %23 = vector.broadcast %22 : f32 to vector<8x1xf32>
    %24 = arith.mulf %19, %23 : vector<8x1xf32>
    %c3 = arith.constant 3 : index
    %25 = memref.load %arg0[%c3] : memref<5xf32, #tpu.memory_space<smem>>
    %26 = vector.broadcast %25 : f32 to vector<8x1xf32>
    %27 = arith.mulf %21, %26 : vector<8x1xf32>
    %28 = arith.addf %24, %27 : vector<8x1xf32>
    %c4 = arith.constant 4 : index
    %29 = memref.load %arg0[%c4] : memref<5xf32, #tpu.memory_space<smem>>
    %30 = vector.broadcast %29 : f32 to vector<8x1xf32>
    %31 = arith.addf %28, %30 : vector<8x1xf32>
    %c0_7 = arith.constant 0 : index
    %c0_8 = arith.constant 0 : index
    %32 = vector.load %arg3[%c0_7, %c0_8] : memref<8x1xf32, #tpu.memory_space<vmem>>, vector<8x1xf32>
    tpu.vector_store %arg3[%c0_7, %c0_8], %31 {strides = array<i32>} : memref<8x1xf32, #tpu.memory_space<vmem>>, vector<8x1xf32>,
    return
  }
}

</mosaic_0001>

<bundles_post_ra>
// kernel: tpu_custom_call.1
= control target key start
LH: loop header
LB: loop body
LE: loop exit
PB: predicated region body
PF: predicated region fallthrough
CT: control target
= control target key end

     0   :  { %8 = vsyncpa [#allocation4], 0  ;;  %s176_s0 = inlined_call_operand.hbm [shape: f32[5], index: 0, kind: input, shape index: {}]   ;;  %s177_s1 = inlined_call_operand.hbm [shape: f32[8,8], index: 1, kind: input, shape index: {}]   ;;  %s178_s2 = inlined_call_operand.vmem [shape: f32[2,8], index: 2, kind: input, shape index: {}]   ;;  %s179_s3 = inlined_call_operand.vmem [shape: f32[8,1], index: 3, kind: output, shape index: {}]  }
   0x1   :  { %9 = vsyncpa [#allocation3], 0  ;;  %s88_s14 = scalar_lea.hbm %s176_s0, 16 }
   0x2   :  { %p89_p0 = scmp.ne.s32.totalorder %s176_s0, %s88_s14  ;;  %p92_p1 = scmp.lt.u32.totalorder %s88_s14, %s176_s0 }
   0x4   :  { %p94_p2 = pnand %p92_p1, %p89_p0 }
   0x6   :  { %97 = shalt.err (!%p94_p2)
}
   0x7   :  { %s124_s19 = smov [#allocation2]   ;;  %s125_s22 = smov [#allocation5]  }
   0x8   :  { %17 = dma.hbm_to_smem %s176_s0, 16, %s124_s19, [#allocation4]  }
   0x9   :  { %s24_s23 = sshll.u32 %s125_s22, 4  ;;  %s98_s26 = scalar_lea.hbm %s177_s1, 128  ;;  %s25_s23 = int_to_ptr.vmem [resolvable:$true] %s24_s23 }
   0xa   :  { %p99_p3 = scmp.ne.s32.totalorder %s177_s1, %s98_s26  ;;  %p102_p4 = scmp.lt.u32.totalorder %s98_s26, %s177_s1 }
   0xc   :  { %p104_p5 = pnand %p102_p4, %p99_p3 }
   0xe   :  { %107 = shalt.err (!%p104_p5)
}
   0xf   :  { %s108_s4 = scalar_lea.vmem %s25_s23, 128  ;;  %p113_p7 = scmp.lt.s32.totalorder %s25_s23, %s25_s23 }
  0x10   :  { %p109_p6 = scmp.ne.s32.totalorder %s25_s23, %s108_s4  ;;  %p114_p8 = scmp.lt.s32.totalorder %s108_s4, %s108_s4 }
  0x12   :  { %p115_p9 = por %p114_p8, %p113_p7 }
  0x14   :  { %p116_p10 = pnand %p115_p9, %p109_p6 }
  0x16   :  { %119 = shalt.err (!%p116_p10)
}
  0x17   :  { %27 = dma.hbm_to_vmem [thread:$0]  %s177_s1, 128, %s25_s23, [#allocation3]  }
  0x18   :  { %120 = dma.done.wait [#allocation4], 16  }
  0x19   :  { %121 = vsyncadd [#allocation4], 4294967280 }
  0x1a   :  { %122 = dma.done.wait [#allocation3], 128  }
  0x1b   :  { %123 = vsyncadd [#allocation3], 4294967168 }
  0x1c   :  { %36 = sfence }
  0x1d   :  { %v39_v0 = vlaneseq  ;;  %v38_v2 = vld [vmem:[%s178_s2] sm:$0x3]  ;;  %v37_v5 = vld [vmem:[#allocation5] sm:$0xff]  ;;  %vm44_vm0 = vcmask 64512   ;;  %s48_s1 = sld [smem:[#allocation2]]  ;;  %s82_s8 = sld [smem:[#allocation2 + $0x1]] }
  0x1e   :  { %s83_s9 = sld [smem:[#allocation2 + $0x2]]  ;;  %s84_s10 = sld [smem:[#allocation2 + $0x3]]  ;;  %vm74_vm1 = vcmask 7168  }
  0x1f   :  { %v40_v1 = vshrl.u32 %v39_v0, 7  ;;  %s85_s2 = sld [smem:[#allocation2 + $0x4]] }
  0x21   :  { %v41_v3 = vsub.s32 0, %v40_v1  ;;  %v53_v4 = vsub.s32 1, %v40_v1 }
  0x23   :  { %v42_v6 = vrot.slane %v38_v2, %v41_v3  ;;  %v54_v7 = vrot.slane %v38_v2, %v53_v4  ;;  %v49_v12 = vstv %s48_s1  ;;  %v60_v15 = vstv %s82_s8 }
  0x24   :  { %v65_v19 = vstv %s83_s9  ;;  %v68_v20 = vstv %s84_s10 }
  0x25   :  { %v43_v8 = vmul.f32 %v42_v6, %v37_v5  ;;  %v55_v9 = vmul.f32 %v54_v7, %v37_v5  ;;  %v72_v24 = vstv %s85_s2 }
  0x27   :  { %v45_v10 = vsel %vm44_vm0, %v43_v8, 0.0  ;;  %v56_v11 = vsel %vm44_vm0, %v55_v9, 0.0 }
  0x28   :  { %46 = vadd.xlane.f32.xlu0 %v45_v10 }
  0x2c   :  { %57 = vadd.xlane.f32.xlu0 %v56_v11 }
  0xb5   :  { %v47_v13 = vpop.xlane.xlu0 %46 }
  0xb6   :  { %v50_v14 = vadd.f32 %v49_v12, %v47_v13 }
  0xb8   :  { %v62_v17 = vmax.f32 %v50_v14, 0.0 }
  0xb9   :  { %v58_v16 = vpop.xlane.xlu0 %57 }
  0xba   :  { %v61_v18 = vadd.f32 %v60_v15, %v58_v16  ;;  %v66_v22 = vmul.f32 %v65_v19, %v62_v17 }
  0xbc   :  { %v63_v21 = vmax.f32 %v61_v18, 0.0 }
  0xbe   :  { %v69_v23 = vmul.f32 %v68_v20, %v63_v21 }
  0xc0   :  { %v70_v25 = vadd.f32 %v69_v23, %v66_v22 }
  0xc2   :  { %v73_v26 = vadd.f32 %v72_v24, %v70_v25 }
  0xc4   :  { %75 = vst.msk [vmem:[%s179_s3] sm:$0xff] %vm74_vm1, %v73_v26 }
  0xc5   :  { %80 = vsyncpa [#allocation3], 1 }
  0xc6   :  { %81 = vsyncpa [#allocation4], 1 }

</bundles_post_ra>
